<compile_context>
chip_gen: v7x
topology: tpu7x:2x2x1
jax: 0.10.0
libtpu: 0.0.40
codegen_flags: <defaults>
</compile_context>

<pallas_src>
import functools

import jax
import jax.numpy as jnp
from jax.experimental import pallas as pl
from jax.experimental.pallas import tpu as pltpu

LANE = 128     # lane (last-dim) alignment for compute intermediates / weights
SUBLANE = 8    # sublane alignment for f32 batch tiles


def _round_up(n, m):
    return ((n + m - 1) // m) * m


def _cdiv(a, b):
    return -(-a // b)


def _pad_axis(a, target, axis):
    pad = target - a.shape[axis]
    if pad == 0:
        return a
    widths = [(0, 0)] * a.ndim
    widths[axis] = (0, pad)
    return jnp.pad(a, widths)


def mlp_kernel(x_ref, w1_ref, b1_ref, w2_ref, b2_ref, w3_ref, b3_ref, o_ref):
    # Weights/biases are VMEM-resident across all batch-grid steps (constant
    # index_maps); x/out tiles are streamed and double-buffered by Pallas.
    wdt = w1_ref.dtype
    x = x_ref[...].astype(wdt)          # no-op for the f32 path

    # l1 + ReLU (f32 accumulation; epilogue stays f32 — no bf16 VALU on v5e).
    h1 = jnp.dot(x, w1_ref[...], preferred_element_type=jnp.float32)
    h1 = jnp.maximum(h1 + b1_ref[...], 0.0)

    # l2 + ReLU
    h2 = jnp.dot(h1.astype(wdt), w2_ref[...],
                 preferred_element_type=jnp.float32)
    h2 = jnp.maximum(h2 + b2_ref[...], 0.0)

    # l3 (no activation) — output lanes stay at the true OUT width.
    out = jnp.dot(h2.astype(wdt), w3_ref[...],
                  preferred_element_type=jnp.float32)
    out = out + b3_ref[...]

    o_ref[...] = out.astype(o_ref.dtype)


@functools.partial(jax.jit, static_argnames=("compute_dtype", "max_tile_b"))
def neural_net_forward(x, w1, b1, w2, b2, w3, b3,
                       *, compute_dtype=jnp.float32, max_tile_b=4096):
    """x: (B, input_size). Returns (B, output_size) f32."""
    B, IN = x.shape
    H1 = w1.shape[1]
    H2 = w2.shape[1]
    OUT = w3.shape[1]

    # Hidden dims lane-aligned (weights + in-kernel intermediates only).
    H1_p = _round_up(H1, LANE)
    H2_p = _round_up(H2, LANE)

    # Batch tiling: aim for an EVEN number of grid steps >= 2 (v7x 2-TC split,
    # and >=2 steps lets the pipeline overlap DMA with compute).  tile_b is a
    # multiple of 8, or the full batch dim when B is tiny (full-dim block).
    steps = max(1, _cdiv(B, max_tile_b))
    if B > SUBLANE:
        steps = max(2, steps)
        if steps % 2:
            steps += 1
    tile_b = min(B, _round_up(_cdiv(B, steps), SUBLANE))
    grid = (_cdiv(B, tile_b),)

    # Weight/bias padding + cast: tiny one-time ops, numerically exact (padded
    # rows/cols/lanes are zero and stay zero through bias + ReLU).
    w1p = _pad_axis(w1, H1_p, 1).astype(compute_dtype)
    w2p = _pad_axis(_pad_axis(w2, H1_p, 0), H2_p, 1).astype(compute_dtype)
    w3p = _pad_axis(w3, H2_p, 0).astype(compute_dtype)
    # Biases stay f32: the add/ReLU epilogue runs in f32 on every chip.
    b1p = _pad_axis(b1, H1_p, 1).astype(jnp.float32)
    b2p = _pad_axis(b2, H2_p, 1).astype(jnp.float32)
    b3p = b3.astype(jnp.float32)

    x_item = jnp.dtype(x.dtype).itemsize
    w_item = jnp.dtype(compute_dtype).itemsize
    cost = pl.CostEstimate(
        flops=2 * B * (IN * H1_p + H1_p * H2_p + H2_p * OUT),
        transcendentals=0,
        bytes_accessed=(B * IN * x_item                       # x read
                        + B * OUT * 4                         # out write
                        + (w1p.size + w2p.size + w3p.size) * w_item
                        + (b1p.size + b2p.size + b3p.size) * 4),
    )

    return pl.pallas_call(
        mlp_kernel,
        out_shape=jax.ShapeDtypeStruct((B, OUT), jnp.float32),
        grid_spec=pltpu.PrefetchScalarGridSpec(
            num_scalar_prefetch=0,
            grid=grid,
            in_specs=[
                # x: streamed per batch tile, unpadded (last dim == full IN).
                pl.BlockSpec((tile_b, IN), lambda i: (i, 0)),
                # Weights / biases: constant index_map -> VMEM-resident.
                pl.BlockSpec((IN, H1_p), lambda i: (0, 0)),
                pl.BlockSpec((1, H1_p), lambda i: (0, 0)),
                pl.BlockSpec((H1_p, H2_p), lambda i: (0, 0)),
                pl.BlockSpec((1, H2_p), lambda i: (0, 0)),
                pl.BlockSpec((H2_p, OUT), lambda i: (0, 0)),
                pl.BlockSpec((1, OUT), lambda i: (0, 0)),
            ],
            # Output at the true OUT width (no 16x lane write amplification);
            # boundary batch block is masked on writeback.
            out_specs=pl.BlockSpec((tile_b, OUT), lambda i: (i, 0)),
        ),
        compiler_params=pltpu.CompilerParams(
            # Shard independent batch tiles across v7x's 2 TensorCores.
            dimension_semantics=("parallel",),
        ),
        cost_estimate=cost,
    )(x, w1p, b1p, w2p, b2p, w3p, b3p)


def init_linear_params(key, fan_in, fan_out):
    """Deterministic init mimicking PyTorch nn.Linear (uniform +/- 1/sqrt(fan_in)).
    Weight stored as (fan_in, fan_out) for direct x @ W use in the kernel."""
    kw, kb = jax.random.split(key)
    bound = 1.0 / jnp.sqrt(jnp.float32(fan_in))
    w = jax.random.uniform(kw, (fan_in, fan_out), jnp.float32, -bound, bound)
    b = jax.random.uniform(kb, (1, fan_out), jnp.float32, -bound, bound)
    return w, b


def _ref_forward(x, w1, b1, w2, b2, w3, b3):
    r = jnp.maximum(x @ w1 + b1, 0.0)
    r = jnp.maximum(r @ w2 + b2, 0.0)
    return r @ w3 + b3


if __name__ == "__main__":
    # Sizes the forward implies: bag-of-words input -> hidden -> hidden -> tags.
    batch = 2
    input_size = 64
    hidden_size = 32
    output_size = 8

    key = jax.random.PRNGKey(0)
    kx, k1, k2, k3 = jax.random.split(key, 4)

    x = jax.random.normal(kx, (batch, input_size), jnp.float32)
    w1, b1 = init_linear_params(k1, input_size, hidden_size)
    w2, b2 = init_linear_params(k2, hidden_size, hidden_size)
    w3, b3 = init_linear_params(k3, hidden_size, output_size)

    ref = _ref_forward(x, w1, b1, w2, b2, w3, b3)

    # f32 path — matches the PyTorch reference exactly.
    out = jax.block_until_ready(neural_net_forward(x, w1, b1, w2, b2, w3, b3))
    assert out.shape == (batch, output_size)
    assert jnp.allclose(out, ref, atol=1e-5, rtol=1e-5)

    # bf16-operand path (f32 accumulation, f32 epilogue) — throughput config
    # on every chip generation (MXUs are bf16-native).
    out_bf16 = jax.block_until_ready(
        neural_net_forward(x, w1, b1, w2, b2, w3, b3,
                           compute_dtype=jnp.bfloat16))
    assert out_bf16.shape == (batch, output_size)
    assert jnp.allclose(out_bf16, ref, atol=5e-2, rtol=5e-2)

    # Larger, non-aligned batch exercises the masked boundary block and the
    # even 2-step grid split (no rounding of B up to tile_b anymore).
    big_batch = 1061
    xb = jax.random.normal(kx, (big_batch, input_size), jnp.float32)
    refb = _ref_forward(xb, w1, b1, w2, b2, w3, b3)
    out_big = jax.block_until_ready(
        neural_net_forward(xb, w1, b1, w2, b2, w3, b3))
    assert out_big.shape == (big_batch, output_size)
    assert jnp.allclose(out_big, refb, atol=1e-4, rtol=1e-4)

    # bf16 activations streamed directly (halved x read bytes, no wrapper cast).
    out_big_bf16 = jax.block_until_ready(
        neural_net_forward(xb.astype(jnp.bfloat16), w1, b1, w2, b2, w3, b3,
                           compute_dtype=jnp.bfloat16))
    assert out_big_bf16.shape == (big_batch, output_size)
    assert jnp.allclose(out_big_bf16, refb, atol=1e-1, rtol=1e-1)

    print("KERNEL_OK")
</pallas_src>

<mosaic_0001>
module attributes {stable_mosaic.version = 11 : i64} {
  func.func @mlp_kernel(%arg0: i32, %arg1: memref<2x64xf32, #tpu.memory_space<vmem>>, %arg2: memref<64x128xf32, #tpu.memory_space<vmem>>, %arg3: memref<1x128xf32, #tpu.memory_space<vmem>>, %arg4: memref<128x128xf32, #tpu.memory_space<vmem>>, %arg5: memref<1x128xf32, #tpu.memory_space<vmem>>, %arg6: memref<128x8xf32, #tpu.memory_space<vmem>>, %arg7: memref<1x8xf32, #tpu.memory_space<vmem>>, %arg8: memref<2x8xf32, #tpu.memory_space<vmem>>) attributes {dimension_semantics = [#tpu.dimension_semantics<parallel>], iteration_bounds = array<i64: 1>, scalar_prefetch = 0 : i64, scratch_operands = 0 : i64, tpu.core_type = #tpu.core_type<tc>, window_params = [{transform_indices = @transform_0, window_bounds = array<i64: 2, 64>}, {pipeline_mode = #tpu.pipeline_mode<synchronous>, transform_indices = @transform_1, window_bounds = array<i64: 64, 128>}, {pipeline_mode = #tpu.pipeline_mode<synchronous>, transform_indices = @transform_2, window_bounds = array<i64: 1, 128>}, {pipeline_mode = #tpu.pipeline_mode<synchronous>, transform_indices = @transform_3, window_bounds = array<i64: 128, 128>}, {pipeline_mode = #tpu.pipeline_mode<synchronous>, transform_indices = @transform_4, window_bounds = array<i64: 1, 128>}, {pipeline_mode = #tpu.pipeline_mode<synchronous>, transform_indices = @transform_5, window_bounds = array<i64: 128, 8>}, {pipeline_mode = #tpu.pipeline_mode<synchronous>, transform_indices = @transform_6, window_bounds = array<i64: 1, 8>}, {transform_indices = @transform_7, window_bounds = array<i64: 2, 8>}]} {
    %c0 = arith.constant 0 : index
    %c0_0 = arith.constant 0 : index
    %0 = vector.load %arg1[%c0, %c0_0] : memref<2x64xf32, #tpu.memory_space<vmem>>, vector<2x64xf32>
    %c0_1 = arith.constant 0 : index
    %c0_2 = arith.constant 0 : index
    %1 = vector.load %arg2[%c0_1, %c0_2] : memref<64x128xf32, #tpu.memory_space<vmem>>, vector<64x128xf32>
    %cst = arith.constant dense<0.000000e+00> : vector<2x128xf32>
    %2 = tpu.matmul %0, %1, %cst {dimension_numbers = #tpu.dot_dimension_numbers<[1], [0], [0], [1], [0, 0, 1, 1], [], []>} : vector<2x64xf32>, vector<64x128xf32>, vector<2x128xf32> -> vector<2x128xf32>
    %c0_3 = arith.constant 0 : index
    %c0_4 = arith.constant 0 : index
    %3 = vector.load %arg3[%c0_3, %c0_4] : memref<1x128xf32, #tpu.memory_space<vmem>>, vector<1x128xf32>
    %4 = vector.broadcast %3 : vector<1x128xf32> to vector<2x128xf32>
    %5 = arith.addf %2, %4 : vector<2x128xf32>
    %cst_5 = arith.constant 0.000000e+00 : f32
    %6 = vector.broadcast %cst_5 : f32 to vector<2x128xf32>
    %7 = arith.maximumf %5, %6 : vector<2x128xf32>
    %c0_6 = arith.constant 0 : index
    %c0_7 = arith.constant 0 : index
    %8 = vector.load %arg4[%c0_6, %c0_7] : memref<128x128xf32, #tpu.memory_space<vmem>>, vector<128x128xf32>
    %cst_8 = arith.constant dense<0.000000e+00> : vector<2x128xf32>
    %9 = tpu.matmul %7, %8, %cst_8 {dimension_numbers = #tpu.dot_dimension_numbers<[1], [0], [0], [1], [0, 0, 1, 1], [], []>} : vector<2x128xf32>, vector<128x128xf32>, vector<2x128xf32> -> vector<2x128xf32>
    %c0_9 = arith.constant 0 : index
    %c0_10 = arith.constant 0 : index
    %10 = vector.load %arg5[%c0_9, %c0_10] : memref<1x128xf32, #tpu.memory_space<vmem>>, vector<1x128xf32>
    %11 = vector.broadcast %10 : vector<1x128xf32> to vector<2x128xf32>
    %12 = arith.addf %9, %11 : vector<2x128xf32>
    %cst_11 = arith.constant 0.000000e+00 : f32
    %13 = vector.broadcast %cst_11 : f32 to vector<2x128xf32>
    %14 = arith.maximumf %12, %13 : vector<2x128xf32>
    %c0_12 = arith.constant 0 : index
    %c0_13 = arith.constant 0 : index
    %15 = vector.load %arg6[%c0_12, %c0_13] : memref<128x8xf32, #tpu.memory_space<vmem>>, vector<128x8xf32>
    %cst_14 = arith.constant dense<0.000000e+00> : vector<2x8xf32>
    %16 = tpu.matmul %14, %15, %cst_14 {dimension_numbers = #tpu.dot_dimension_numbers<[1], [0], [0], [1], [0, 0, 1, 1], [], []>} : vector<2x128xf32>, vector<128x8xf32>, vector<2x8xf32> -> vector<2x8xf32>
    %c0_15 = arith.constant 0 : index
    %c0_16 = arith.constant 0 : index
    %17 = vector.load %arg7[%c0_15, %c0_16] : memref<1x8xf32, #tpu.memory_space<vmem>>, vector<1x8xf32>
    %18 = vector.broadcast %17 : vector<1x8xf32> to vector<2x8xf32>
    %19 = arith.addf %16, %18 : vector<2x8xf32>
    %c0_17 = arith.constant 0 : index
    %c0_18 = arith.constant 0 : index
    %20 = vector.load %arg8[%c0_17, %c0_18] : memref<2x8xf32, #tpu.memory_space<vmem>>, vector<2x8xf32>
    tpu.vector_store %arg8[%c0_17, %c0_18], %19 {strides = array<i32>} : memref<2x8xf32, #tpu.memory_space<vmem>>, vector<2x8xf32>,
    return
  }
  func.func @transform_0(%arg0: i32) -> (i32, i32) {
    %c0_i32 = arith.constant 0 : i32
    %c0_i32_0 = arith.constant 0 : i32
    return %arg0, %c0_i32 : i32, i32
  }
  func.func @transform_1(%arg0: i32) -> (i32, i32) {
    %c0_i32 = arith.constant 0 : i32
    %c0_i32_0 = arith.constant 0 : i32
    %c0_i32_1 = arith.constant 0 : i32
    return %c0_i32, %c0_i32_0 : i32, i32
  }
  func.func @transform_2(%arg0: i32) -> (i32, i32) {
    %c0_i32 = arith.constant 0 : i32
    %c0_i32_0 = arith.constant 0 : i32
    %c0_i32_1 = arith.constant 0 : i32
    return %c0_i32, %c0_i32_0 : i32, i32
  }
  func.func @transform_3(%arg0: i32) -> (i32, i32) {
    %c0_i32 = arith.constant 0 : i32
    %c0_i32_0 = arith.constant 0 : i32
    %c0_i32_1 = arith.constant 0 : i32
    return %c0_i32, %c0_i32_0 : i32, i32
  }
  func.func @transform_4(%arg0: i32) -> (i32, i32) {
    %c0_i32 = arith.constant 0 : i32
    %c0_i32_0 = arith.constant 0 : i32
    %c0_i32_1 = arith.constant 0 : i32
    return %c0_i32, %c0_i32_0 : i32, i32
  }
  func.func @transform_5(%arg0: i32) -> (i32, i32) {
    %c0_i32 = arith.constant 0 : i32
    %c0_i32_0 = arith.constant 0 : i32
    %c0_i32_1 = arith.constant 0 : i32
    return %c0_i32, %c0_i32_0 : i32, i32
  }
  func.func @transform_6(%arg0: i32) -> (i32, i32) {
    %c0_i32 = arith.constant 0 : i32
    %c0_i32_0 = arith.constant 0 : i32
    %c0_i32_1 = arith.constant 0 : i32
    return %c0_i32, %c0_i32_0 : i32, i32
  }
  func.func @transform_7(%arg0: i32) -> (i32, i32) {
    %c0_i32 = arith.constant 0 : i32
    %c0_i32_0 = arith.constant 0 : i32
    return %arg0, %c0_i32 : i32, i32
  }
}

</mosaic_0001>

<bundles_post_ra>
// kernel: neural_net_forward.1
= control target key start
LH: loop header
LB: loop body
LE: loop exit
PB: predicated region body
PF: predicated region fallthrough
CT: control target
= control target key end

     0   :  { %v545_v3 = vmov 0.0|0.0   ;;  %vm546_vm0 = vmmov 0   ;;  %v547_v6 = vmov 0.0   ;;  %s756_s0 = inlined_call_operand.vmem [shape: f32[2,64], index: 0, kind: input, shape index: {}]   ;;  %s757_s1 = inlined_call_operand.vmem [shape: f32[64,128], index: 1, kind: input, shape index: {}]   ;;  %s758_s2 = inlined_call_operand.vmem [shape: f32[1,128], index: 2, kind: input, shape index: {}]   ;;  %s759_s3 = inlined_call_operand.vmem [shape: f32[128,128], index: 3, kind: input, shape index: {}]   ;;  %s760_s4 = inlined_call_operand.vmem [shape: f32[1,128], index: 4, kind: input, shape index: {}]   ;;  %s761_s5 = inlined_call_operand.vmem [shape: f32[128,8], index: 5, kind: input, shape index: {}]   ;;  %s762_s6 = inlined_call_operand.vmem [shape: f32[1,8], index: 6, kind: input, shape index: {}]   ;;  %s763_s7 = inlined_call_operand.hbm [shape: f32[2,8], index: 7, kind: output, shape index: {}]  }
   0x1   :  { %v28_v0 = vld [vmem:[%s757_s1] sm:$0xff]  ;;  %v29_v1 = vld [vmem:[%s757_s1 + $0x8] sm:$0xff]  ;;  %v30_v2 = vld [vmem:[%s757_s1 + $0x10] sm:$0xff]  ;;  %457 = vmatprep.subr.bf16.mxu0 %v545_v3  ;;  %384 = vmatprep.mubr.msk.f32.mxu0 %vm546_vm0, %v547_v6 }
   0x2   :  { %v458_v4 = vpack.c.bf16 %v29_v1, %v28_v0  ;;  %v31_v5 = vld [vmem:[%s757_s1 + $0x18] sm:$0xff]  ;;  %469 = vmatprep.subr.bf16.mxu1 %v545_v3  ;;  %419 = vmatprep.mubr.msk.f32.mxu1 %vm546_vm0, %v547_v6  ;;  %v118_v8 = vld [vmem:[%s759_s3] sm:$0xff]  ;;  %v119_v9 = vld [vmem:[%s759_s3 + $0x8] sm:$0xff] }
   0x3   :  { %v461_v7 = vpack.c.bf16 %v31_v5, %v30_v2  ;;  %v120_v10 = vld [vmem:[%s759_s3 + $0x10] sm:$0xff]  ;;  %v32_v11 = vld [vmem:[%s757_s1 + $0x20] sm:$0xff]  ;;  %v33_v12 = vld [vmem:[%s757_s1 + $0x28] sm:$0xff]  ;;  %v470_v13 = vpack.c.bf16 %v119_v9, %v118_v8 }
   0x4   :  { %459 = vmatpush3.bf16.msra.mxu0 %v458_v4  ;;  %v121_v14 = vld [vmem:[%s759_s3 + $0x18] sm:$0xff]  ;;  %v464_v16 = vpack.c.bf16 %v33_v12, %v32_v11  ;;  %v122_v17 = vld [vmem:[%s759_s3 + $0x20] sm:$0xff]  ;;  %v123_v18 = vld [vmem:[%s759_s3 + $0x28] sm:$0xff] }
   0x5   :  { %460 = vmatprep.subr.bf16.mxu0 %v545_v3  ;;  %471 = vmatpush3.bf16.msra.mxu1 %v470_v13  ;;  %v473_v15 = vpack.c.bf16 %v121_v14, %v120_v10  ;;  %v34_v19 = vld [vmem:[%s757_s1 + $0x30] sm:$0xff]  ;;  %v35_v20 = vld [vmem:[%s757_s1 + $0x38] sm:$0xff] }
   0x6   :  { %472 = vmatprep.subr.bf16.mxu1 %v545_v3 }
   0x8   :  { %462 = vmatpush3.bf16.msra.mxu0 %v461_v7 }
   0x9   :  { %463 = vmatprep.subr.bf16.mxu0 %v545_v3 }
   0xa   :  { %12 = vsyncpa [#allocation3], 0  ;;  %474 = vmatpush3.bf16.msra.mxu1 %v473_v15  ;;  %v476_v21 = vpack.c.bf16 %v123_v18, %v122_v17  ;;  %v467_v22 = vpack.c.bf16 %v35_v20, %v34_v19  ;;  %v124_v23 = vld [vmem:[%s759_s3 + $0x30] sm:$0xff]  ;;  %v125_v24 = vld [vmem:[%s759_s3 + $0x38] sm:$0xff]  ;;  %vm43_vm1 = vcmask 523264   ;;  %s548_s12 = smov [#allocation2]  }
   0xb   :  { %475 = vmatprep.subr.bf16.mxu1 %v545_v3  ;;  %v479_v25 = vpack.c.bf16 %v125_v24, %v124_v23  ;;  %v27_v26 = vld [vmem:[%s756_s0] sm:$0x3]  ;;  %v127_v28 = vld [vmem:[%s759_s3 + $0x48] sm:$0xff]  ;;  %v128_v30 = vld [vmem:[%s759_s3 + $0x50] sm:$0xff]  ;;  %s313_s13 = sshll.u32 %s548_s12, 4  ;;  %vm305_vm2 = vcmask 58368   ;;  %s314_s13 = int_to_ptr.vmem [resolvable:$true] %s313_s13 }
   0xc   :  { %465 = vmatpush3.bf16.msra.mxu0 %v464_v16  ;;  %v126_v27 = vld [vmem:[%s759_s3 + $0x40] sm:$0xff]  ;;  %v129_v31 = vld [vmem:[%s759_s3 + $0x58] sm:$0xff]  ;;  %v131_v34 = vld [vmem:[%s759_s3 + $0x68] sm:$0xff]  ;;  %p526_p1 = scmp.lt.s32.totalorder %s314_s13, %s314_s13 }
   0xd   :  { %466 = vmatprep.subr.bf16.mxu0 %v545_v3  ;;  %v482_v29 = vpack.c.bf16 %v127_v28, %v126_v27  ;;  %v485_v32 = vpack.c.bf16 %v129_v31, %v128_v30  ;;  %v130_v33 = vld [vmem:[%s759_s3 + $0x60] sm:$0xff]  ;;  %v132_v36 = vld [vmem:[%s759_s3 + $0x70] sm:$0xff]  ;;  %v133_v37 = vld [vmem:[%s759_s3 + $0x78] sm:$0xff] }
   0xe   :  { %477 = vmatpush3.bf16.msra.mxu1 %v476_v21  ;;  %v488_v35 = vpack.c.bf16 %v131_v34, %v130_v33  ;;  %v491_v38 = vpack.c.bf16 %v133_v37, %v132_v36  ;;  %v212_v39 = vld [vmem:[%s761_s5] sm:$0xff]  ;;  %v213_v40 = vld [vmem:[%s761_s5 + $0x8] sm:$0xff]  ;;  %v214_v41 = vld [vmem:[%s761_s5 + $0x10] sm:$0xff] }
   0xf   :  { %478 = vmatprep.subr.bf16.mxu1 %v545_v3  ;;  %v494_v42 = vpack.c.bf16 %v213_v40, %v212_v39  ;;  %v215_v43 = vld [vmem:[%s761_s5 + $0x18] sm:$0xff]  ;;  %v216_v45 = vld [vmem:[%s761_s5 + $0x20] sm:$0xff]  ;;  %v217_v46 = vld [vmem:[%s761_s5 + $0x28] sm:$0xff] }
  0x10   :  { %468 = vmatpush3.bf16.msra.mxu0 %v467_v22  ;;  %v497_v44 = vpack.c.bf16 %v215_v43, %v214_v41  ;;  %v500_v47 = vpack.c.bf16 %v217_v46, %v216_v45  ;;  %v218_v48 = vld [vmem:[%s761_s5 + $0x30] sm:$0xff]  ;;  %v219_v49 = vld [vmem:[%s761_s5 + $0x38] sm:$0xff]  ;;  %v220_v51 = vld [vmem:[%s761_s5 + $0x40] sm:$0xff] }
  0x11   :  { %493 = vmatprep.subr.bf16.mxu0 %v545_v3  ;;  %v503_v50 = vpack.c.bf16 %v219_v49, %v218_v48  ;;  %v221_v52 = vld [vmem:[%s761_s5 + $0x48] sm:$0xff]  ;;  %v222_v54 = vld [vmem:[%s761_s5 + $0x50] sm:$0xff]  ;;  %v223_v55 = vld [vmem:[%s761_s5 + $0x58] sm:$0xff] }
  0x12   :  { %480 = vmatpush3.bf16.msra.mxu1 %v479_v25  ;;  %v506_v53 = vpack.c.bf16 %v221_v52, %v220_v51  ;;  %v509_v56 = vpack.c.bf16 %v223_v55, %v222_v54  ;;  %v224_v57 = vld [vmem:[%s761_s5 + $0x60] sm:$0xff]  ;;  %v225_v58 = vld [vmem:[%s761_s5 + $0x68] sm:$0xff]  ;;  %v226_v1 = vld [vmem:[%s761_s5 + $0x70] sm:$0xff] }
  0x13   :  { %385 = vmatmul.mubr.msk.f32.vlgmr.msra.gmra.mrb[0].mxu0 %vm43_vm1, %v27_v26  ;;  %481 = vmatprep.subr.bf16.mxu1 %v545_v3  ;;  %v512_v59 = vpack.c.bf16 %v225_v58, %v224_v57  ;;  %v321_v60 = vld [vmem:[%s758_s2] ss:$0 sm:$0xff]  ;;  %v227_v2 = vld [vmem:[%s761_s5 + $0x78] sm:$0xff]  ;;  %s521_s5 = scalar_lea.vmem %s314_s13, 32 }
  0x14   :  { %454 = vmatprep.mubr.msk.f32.mxu0 %vm546_vm0, %v547_v6  ;;  %495 = vmatpush3.bf16.msra.mxu0 %v494_v42  ;;  %v515_v4 = vpack.c.bf16 %v227_v2, %v226_v1  ;;  %v324_v9 = vld [vmem:[%s762_s6] ss:$0 sm:$0xff]  ;;  %p522_p0 = scmp.ne.s32.totalorder %s314_s13, %s521_s5  ;;  %p527_p2 = scmp.lt.s32.totalorder %s521_s5, %s521_s5 }
  0x15   :  { %496 = vmatprep.subr.bf16.mxu0 %v545_v3 }
  0x16   :  { %483 = vmatpush3.bf16.msra.mxu1 %v482_v29  ;;  %p528_p3 = por %p527_p2, %p526_p1 }
  0x17   :  { %484 = vmatprep.subr.bf16.mxu1 %v545_v3 }
  0x18   :  { %498 = vmatpush3.bf16.msra.mxu0 %v497_v44  ;;  %p529_p4 = pnand %p528_p3, %p522_p0 }
  0x19   :  { %499 = vmatprep.subr.bf16.mxu0 %v545_v3 }
  0x1a   :  { %486 = vmatpush3.bf16.msra.mxu1 %v485_v32 }
  0x1b   :  { %487 = vmatprep.subr.bf16.mxu1 %v545_v3 }
  0x1c   :  { %501 = vmatpush3.bf16.msra.mxu0 %v500_v47 }
  0x1d   :  { %502 = vmatprep.subr.bf16.mxu0 %v545_v3 }
  0x1e   :  { %489 = vmatpush3.bf16.msra.mxu1 %v488_v35 }
  0x1f   :  { %490 = vmatprep.subr.bf16.mxu1 %v545_v3 }
  0x20   :  { %504 = vmatpush3.bf16.msra.mxu0 %v503_v50 }
  0x21   :  { %505 = vmatprep.subr.bf16.mxu0 %v545_v3 }
  0x22   :  { %492 = vmatpush3.bf16.msra.mxu1 %v491_v38 }
  0x24   :  { %507 = vmatpush3.bf16.msra.mxu0 %v506_v53 }
  0x25   :  { %508 = vmatprep.subr.bf16.mxu0 %v545_v3 }
  0x28   :  { %510 = vmatpush3.bf16.msra.mxu0 %v509_v56 }
  0x29   :  { %511 = vmatprep.subr.bf16.mxu0 %v545_v3 }
  0x2c   :  { %513 = vmatpush3.bf16.msra.mxu0 %v512_v59 }
  0x2d   :  { %514 = vmatprep.subr.bf16.mxu0 %v545_v3  ;;  %v323_v3 = vld [vmem:[%s760_s4] ss:$0 sm:$0xff] }
  0x30   :  { %516 = vmatpush3.bf16.msra.mxu0 %v515_v4 }
  0xe6   :  { %v113_v61 = vpop.f32.mrb[0].mxu0 }
  0xe7   :  { %v114_v62 = vadd.f32 %v321_v60, %v113_v61  ;;  %v386_v63 = vpop.f32.mrb[1].mxu0 }
  0xe9   :  { %v117_v0 = vmax.f32 %v114_v62, 0.0 }
  0xeb   :  { %420 = vmatmul.mubr.f32.vlgmr.msra.gmra.mrb[0].mxu1 %v117_v0 }
 0x1be   :  { %v207_v5 = vpop.f32.mrb[0].mxu1 }
 0x1bf   :  { %v208_v6 = vadd.f32 %v323_v3, %v207_v5  ;;  %v421_v7 = vpop.f32.mrb[1].mxu1 }
 0x1c1   :  { %v211_v8 = vmax.f32 %v208_v6, 0.0 }
 0x1c3   :  { %455 = vmatmul.mubr.f32.vlgmr.msra.gmra.mrb[2].mxu0 %v211_v8 }
 0x296   :  { %v301_v10 = vpop.f32.mrb[2].mxu0 }
 0x297   :  { %v302_v11 = vadd.f32 %v324_v9, %v301_v10  ;;  %v456_v12 = vpop.f32.mrb[3].mxu0 }
 0x299   :  { %306 = vst.msk [vmem:[#allocation2] sm:$0x3] %vm305_vm2, %v302_v11 }
 0x29a   :  { %532 = shalt.err (!%p529_p4)
}
 0x29b   :  { %s533_s15 = scalar_lea.hbm %s763_s7, 32 }
 0x29c   :  { %p534_p5 = scmp.ne.s32.totalorder %s763_s7, %s533_s15  ;;  %p537_p6 = scmp.lt.u32.totalorder %s533_s15, %s763_s7 }
 0x29e   :  { %p539_p7 = pnand %p537_p6, %p534_p5 }
 0x2a0   :  { %542 = shalt.err (!%p539_p7)
}
 0x2a1   :  { %316 = dma.vmem_to_hbm [thread:$0]  %s314_s13, 32, %s763_s7, [#allocation3]  }
 0x2a2   :  { %543 = dma.done.wait [#allocation3], 32  }
 0x2a3   :  { %544 = vsyncadd [#allocation3], 4294967264 }
 0x2a4   :  { %320 = vsyncpa [#allocation3], 1 }

</bundles_post_ra>
